<compile_context>
chip_gen: v5e
topology: v5e:2x2
jax: 0.10.0
libtpu: 0.0.40
codegen_flags: <defaults>
</compile_context>

<pallas_src>
import jax
import jax.numpy as jnp
from jax.experimental import pallas as pl
from jax.experimental.pallas import tpu as pltpu


def _relu_kernel(x_ref, o_ref):
    o_ref[...] = jnp.maximum(x_ref[...], jnp.zeros((), x_ref.dtype))


def _round_up(a, b):
    return -(-a // b) * b


def _device_kind_lower():
    try:
        return jax.devices()[0].device_kind.lower()
    except Exception:
        return ""


def relu_pallas(x, donate=False):
    """Elementwise ReLU matching torch.relu(x) (shape & dtype preserved).

    Set donate=True only if the caller gives up `x` (enables in-place HBM reuse
    via input_output_aliases).
    """
    orig_shape = x.shape
    orig_dtype = x.dtype
    n = x.size
    if n == 0:
        return x

    # Non-multiple-of-128 sizes: the old pad + slice path cost ~3x HBM traffic
    # around a purely HBM-bound kernel. XLA's elementwise max is already at
    # roofline for this case, so just use it.
    if n % 128 != 0:
        return jnp.maximum(x, jnp.zeros((), orig_dtype))

    itemsize = jnp.dtype(orig_dtype).itemsize
    # Native packed-vreg sublane count: 8 for 4-byte, 16 for bf16, 32 for int8/fp8.
    sublane = max(8, 32 // itemsize)

    # Widest lane-dense last dim that divides n (fewer rows, wide unmasked stores).
    lane = 128
    for cand in (1024, 512, 256):
        if n % cand == 0:
            lane = cand
            break
    nrows = n // lane
    x2d = x.reshape(nrows, lane)  # pure reshape, no pad copy

    # Generation detection (string match keeps this robust across jax versions).
    kind = _device_kind_lower()
    is_v7x = "v7" in kind
    is_v5e = ("v5 lite" in kind) or ("v5e" in kind) or ("v5litepod" in kind)

    # Block size: ~2 MiB on v5e (~820 GB/s -> per-step overhead already <7%),
    # ~4 MiB on v6e/v7x where faster HBM makes the fixed per-step cost matter.
    target_block_bytes = (2 if is_v5e else 4) * 1024 * 1024
    tile_rows = max(
        sublane, (target_block_bytes // (lane * itemsize)) // sublane * sublane
    )

    if tile_rows >= nrows:
        # Whole array fits in one block.
        if is_v7x and nrows >= 2 * sublane:
            # Split into 2 grid steps so the 'parallel' axis can use both v7x TCs.
            tile_rows = _round_up(-(-nrows // 2), sublane)
        else:
            # Single full-array block (legal even when nrows < 8 / not a multiple
            # of 8, since the block equals the full array dims).
            tile_rows = nrows
    grid = (pl.cdiv(nrows, tile_rows),)  # partial last block handled by Pallas

    call_kwargs = {}
    if donate:
        call_kwargs["input_output_aliases"] = {0: 0}

    # TODO(synk): if an xprof trace on v7x shows exposed DMA issue latency,
    # sweep pipeline_mode=pl.Buffered(3) on the input BlockSpec (20 MiB VMEM).
    out2d = pl.pallas_call(
        _relu_kernel,
        out_shape=jax.ShapeDtypeStruct((nrows, lane), orig_dtype),
        grid_spec=pltpu.PrefetchScalarGridSpec(
            num_scalar_prefetch=0,
            grid=grid,
            in_specs=[pl.BlockSpec((tile_rows, lane), lambda i: (i, 0))],
            out_specs=pl.BlockSpec((tile_rows, lane), lambda i: (i, 0)),
        ),
        compiler_params=pltpu.CompilerParams(
            dimension_semantics=("parallel",),
            vmem_limit_bytes=32 * 1024 * 1024,
        ),
        cost_estimate=pl.CostEstimate(
            flops=n, transcendentals=0, bytes_accessed=2 * n * itemsize
        ),
        **call_kwargs,
    )(x2d)

    return out2d.reshape(orig_shape)


if __name__ == "__main__":
    key = jax.random.PRNGKey(0)
    x = jax.random.normal(key, (2, 4, 16, 16), dtype=jnp.float32)  # NCHW

    y = relu_pallas(x)
    jax.block_until_ready(y)

    # Correctness check against plain JAX reference.
    y_ref = jnp.maximum(x, 0.0)
    assert y.shape == x.shape and y.dtype == x.dtype
    assert jnp.allclose(y, y_ref), "mismatch vs reference ReLU"

    # Non-multiple-of-128 size: exercises the XLA-fallback path (no pad/slice).
    x_odd = jax.random.normal(jax.random.PRNGKey(1), (3, 5, 7), dtype=jnp.float32)
    y_odd = relu_pallas(x_odd)
    jax.block_until_ready(y_odd)
    assert y_odd.shape == x_odd.shape and y_odd.dtype == x_odd.dtype
    assert jnp.allclose(y_odd, jnp.maximum(x_odd, 0.0)), "mismatch (odd shape)"

    # bf16 path (different sublane packing) on an aligned size.
    x_bf16 = jax.random.normal(jax.random.PRNGKey(2), (4, 8, 32), dtype=jnp.bfloat16)
    y_bf16 = relu_pallas(x_bf16)
    jax.block_until_ready(y_bf16)
    assert y_bf16.dtype == jnp.bfloat16
    assert jnp.array_equal(
        y_bf16, jnp.maximum(x_bf16, jnp.zeros((), jnp.bfloat16))
    ), "mismatch (bf16)"

    print("KERNEL_OK")
</pallas_src>

<mosaic_0001>
module attributes {stable_mosaic.version = 11 : i64} {
  func.func @_relu_kernel(%arg0: i32, %arg1: memref<2x1024xf32, #tpu.memory_space<vmem>>, %arg2: memref<2x1024xf32, #tpu.memory_space<vmem>>) attributes {dimension_semantics = [#tpu.dimension_semantics<parallel>], iteration_bounds = array<i64: 1>, scalar_prefetch = 0 : i64, scratch_operands = 0 : i64, tpu.core_type = #tpu.core_type<tc>, window_params = [{transform_indices = @transform_0, window_bounds = array<i64: 2, 1024>}, {transform_indices = @transform_1, window_bounds = array<i64: 2, 1024>}]} {
    %c0 = arith.constant 0 : index
    %c0_0 = arith.constant 0 : index
    %0 = vector.load %arg1[%c0, %c0_0] : memref<2x1024xf32, #tpu.memory_space<vmem>>, vector<2x1024xf32>
    %cst = arith.constant 0.000000e+00 : f32
    %1 = vector.broadcast %cst : f32 to vector<2x1024xf32>
    %2 = arith.maximumf %0, %1 : vector<2x1024xf32>
    %c0_1 = arith.constant 0 : index
    %c0_2 = arith.constant 0 : index
    %3 = vector.load %arg2[%c0_1, %c0_2] : memref<2x1024xf32, #tpu.memory_space<vmem>>, vector<2x1024xf32>
    tpu.vector_store %arg2[%c0_1, %c0_2], %2 {strides = array<i32>} : memref<2x1024xf32, #tpu.memory_space<vmem>>, vector<2x1024xf32>,
    return
  }
  func.func @transform_0(%arg0: i32) -> (i32, i32) {
    %c0_i32 = arith.constant 0 : i32
    %c0_i32_0 = arith.constant 0 : i32
    return %arg0, %c0_i32 : i32, i32
  }
  func.func @transform_1(%arg0: i32) -> (i32, i32) {
    %c0_i32 = arith.constant 0 : i32
    %c0_i32_0 = arith.constant 0 : i32
    return %arg0, %c0_i32 : i32, i32
  }
}

</mosaic_0001>

<bundles_post_ra>
// kernel: tpu_custom_call.1
= control target key start
LH: loop header
LB: loop body
LE: loop exit
PB: predicated region body
PF: predicated region fallthrough
CT: control target
= control target key end

     0   :  { %6 = vsyncpa [#allocation3], 0  ;;  %s118_s0 = inlined_call_operand.hbm [shape: f32[2,1024], index: 0, kind: input, shape index: {}]   ;;  %s119_s1 = inlined_call_operand.hbm [shape: f32[2,1024], index: 1, kind: output, shape index: {}]  }
   0x1   :  { %7 = vsyncpa [#allocation4], 0  ;;  %s13_s8 = sshll.u32 %s118_s0, 4  ;;  %s100_s9 = smov [#allocation2]   ;;  %s14_s8 = int_to_ptr.hbm [resolvable:$true] %s13_s8 }
   0x2   :  { %s15_s10 = sshll.u32 %s100_s9, 4  ;;  %s16_s10 = int_to_ptr.vmem [resolvable:$true] %s15_s10 }
   0x3   :  { %18 = dma.hbm_to_vmem [thread:$0]  %s14_s8, 256, %s16_s10, [#allocation3]  }
   0x4   :  { %96 = dma.done.wait [#allocation3], 256  }
   0x5   :  { %97 = vsyncadd [#allocation3], 4294967040  ;;  %s101_s11 = smov [#allocation5]   ;;  %s36_s15 = sshll.u32 %s119_s1, 4  ;;  %v23_v0 = vld [vmem:[#allocation2] sm:$0xff]  ;;  %v24_v1 = vld [vmem:[#allocation2 + $0x8] sm:$0xff]  ;;  %s37_s15 = int_to_ptr.hbm [resolvable:$true] %s36_s15 }
   0x6   :  { %s34_s12 = sshll.u32 %s101_s11, 4  ;;  %v25_v2 = vmax.f32 %v23_v0, 0.0  ;;  %v26_v3 = vmax.f32 %v24_v1, 0.0  ;;  %s35_s12 = int_to_ptr.vmem [resolvable:$true] %s34_s12 }
   0x8   :  { %27 = vst [vmem:[#allocation5] sm:$0xff] %v25_v2 }
   0x9   :  { %28 = vst [vmem:[#allocation5 + $0x8] sm:$0xff] %v26_v3 }
   0xa   :  { %39 = dma.vmem_to_hbm [thread:$0]  %s35_s12, 256, %s37_s15, [#allocation4]  }
   0xb   :  { %98 = dma.done.wait [#allocation4], 256  }
   0xc   :  { %99 = vsyncadd [#allocation4], 4294967040 }
   0xd   :  { %44 = vsyncpa [#allocation3], 1 }
   0xe   :  { %45 = vsyncpa [#allocation4], 1 }

</bundles_post_ra>
